<compile_context>
chip_gen: v5e
topology: v5e:2x2
jax: 0.10.0
libtpu: 0.0.40
codegen_flags: <defaults>
</compile_context>

<pallas_src>
import functools

import jax
import jax.numpy as jnp
from jax.experimental import pallas as pl
from jax.experimental.pallas import tpu as pltpu


# ----------------------------------------------------------------------------
# Recurrent kernel: one grid step == Tb GRU time steps for one batch shard.
# The hidden-state carry lives in hcarry_ref (output block with a batch-only
# index_map -> VMEM-resident across the whole "arbitrary" time axis).
# ----------------------------------------------------------------------------
def _gru_recurrent_kernel(
    gxzr_ref,    # [Tb, Nb, 2H] precomputed x-side pre-acts for (z | r), f32
    gxt_ref,     # [Tb, Nb, H]  precomputed x-side pre-acts for hHat, f32
    h0_ref,      # [Nb, H]      initial hidden state
    wh2_ref,     # [H, 2H]      h-side weights for (z | r)   (bf16 or f32)
    wth_ref,     # [H, H]       h-side weight for hHat (applied to r*h)
    hseq_ref,    # [Tb, Nb, H]  hidden states for this time block (output)
    hcarry_ref,  # [Nb, H]      h carry / final hidden state   (output)
    *,
    seq_len,     # true T (before padding)
    time_block,  # Tb
    dim_hidden,  # H
    guard_tail,  # whether padded tail steps exist
):
    H = dim_hidden
    t_blk = pl.program_id(1)

    @pl.when(t_blk == 0)
    def _():
        hcarry_ref[...] = h0_ref[...]

    # Hoisted out of the inner time loop: grid-constant, VMEM-resident weights.
    w_h2 = wh2_ref[...]
    w_th = wth_ref[...]

    def step(i, h):
        # x-side contributions (incl. biases) were computed in bulk outside.
        pre_zr = gxzr_ref[i] + jnp.dot(
            h.astype(w_h2.dtype), w_h2, preferred_element_type=jnp.float32)
        zr = jax.nn.sigmoid(pre_zr)
        # NB: module naming is swapped on purpose - "resetGate" drives the blend z.
        z = zr[:, :H]            # lane-tile aligned once H % 128 == 0
        r = zr[:, H:]
        pre_t = gxt_ref[i] + jnp.dot(
            (r * h).astype(w_th.dtype), w_th, preferred_element_type=jnp.float32)
        h_hat = jnp.tanh(pre_t)
        h_new = (1.0 - z) * h + z * h_hat
        if guard_tail:
            # Padded steps past the true sequence end leave the carry unchanged.
            h_new = jnp.where(t_blk * time_block + i < seq_len, h_new, h)
        hseq_ref[i] = h_new.astype(hseq_ref.dtype)
        return h_new

    h = hcarry_ref[...].astype(jnp.float32)
    h_final = jax.lax.fori_loop(0, time_block, step, h, unroll=True)
    hcarry_ref[...] = h_final.astype(hcarry_ref.dtype)


# ----------------------------------------------------------------------------
# One-time parameter preparation (layout + packing + dtype), hoisted off the
# per-call path. PyTorch convention: w_* are [out, in] with in = cat(h, x).
# ----------------------------------------------------------------------------
def prepare_params(params, dim_feature, dim_hidden, *, recur_dtype=jnp.bfloat16):
    H, F = dim_hidden, dim_feature

    def split(w):  # [H, H+F] -> ([H, H] h-part, [F, H] x-part), transposed
        return jnp.transpose(w[:, :H]), jnp.transpose(w[:, H:])

    wz_h, wz_x = split(params["w_reset"])
    wr_h, wr_x = split(params["w_update"])
    wt_h, wt_x = split(params["w_transform"])

    return {
        # Bulk (non-recurrent) projections stay f32; XLA runs them once.
        "w_x3": jnp.concatenate([wz_x, wr_x, wt_x], axis=1),           # [F, 3H]
        "b3": jnp.concatenate(
            [params["b_reset"], params["b_update"], params["b_transform"]]
        ).reshape(1, 3 * H),                                            # [1, 3H]
        "wo": jnp.transpose(params["w_output"]),                        # [H, F]
        "bo": params["b_output"].reshape(1, F),                         # [1, F]
        # Recurrent (in-kernel) weights: bf16 MXU operands by default.
        "w_h2": jnp.concatenate([wz_h, wr_h], axis=1).astype(recur_dtype),  # [H, 2H]
        "w_th": wt_h.astype(recur_dtype),                                   # [H, H]
    }


# ----------------------------------------------------------------------------
# Wrappers.
# ----------------------------------------------------------------------------
def gru_sequence(xs, h0, prep, *, time_block=8, batch_block=None,
                 single_buffer_weights=False):
    """Run the GRU cell over a sequence.

    xs: [T, N, F], h0: [N, H]. Returns (os [T, N, F], h_final [N, H]).
    """
    T, N, F = xs.shape
    _, H = h0.shape
    Nb = N if batch_block is None else batch_block
    assert N % Nb == 0, "batch_block must divide the batch"
    Tb = max(1, min(time_block, T))
    T_pad = pl.cdiv(T, Tb) * Tb
    f32 = jnp.float32

    # --- 1) Bulk x-side projection: hoisted off the serial critical path. ----
    gx = (jnp.dot(xs.reshape(T * N, F), prep["w_x3"],
                  preferred_element_type=f32)
          + prep["b3"]).reshape(T, N, 3 * H)
    gx_zr = gx[..., : 2 * H]
    gx_t = gx[..., 2 * H:]
    if T_pad != T:
        pad = ((0, T_pad - T), (0, 0), (0, 0))
        gx_zr = jnp.pad(gx_zr, pad)
        gx_t = jnp.pad(gx_t, pad)

    # --- 2) Recurrent kernel: only h-dependent work remains serialized. ------
    def moving(shape):
        return pl.BlockSpec(shape, lambda b, t: (t, b, 0))

    def per_shard(shape):
        return pl.BlockSpec(shape, lambda b, t: (b, 0))

    def resident(shape):
        idx = lambda b, t, _n=len(shape): (0,) * _n
        if single_buffer_weights:
            # v7x: grid-constant weights need only one VMEM buffer.
            return pl.BlockSpec(shape, idx, pipeline_mode=pl.Buffered(1))
        return pl.BlockSpec(shape, idx)

    grid = (N // Nb, T_pad // Tb)

    flops = 2 * T * N * (H * 2 * H + H * H) + 12 * T * N * H
    bytes_accessed = (
        4 * (gx_zr.size + gx_t.size + h0.size + T_pad * N * H + N * H)
        + prep["w_h2"].size * prep["w_h2"].dtype.itemsize
        + prep["w_th"].size * prep["w_th"].dtype.itemsize
    )

    kernel = functools.partial(
        _gru_recurrent_kernel,
        seq_len=T, time_block=Tb, dim_hidden=H, guard_tail=(T_pad != T))

    h_seq, h_final = pl.pallas_call(
        kernel,
        grid=grid,
        in_specs=[
            moving((Tb, Nb, 2 * H)),   # gx_zr time/batch block
            moving((Tb, Nb, H)),       # gx_t  time/batch block
            per_shard((Nb, H)),        # h0
            resident((H, 2 * H)),      # w_h2 (z | r), grid-constant
            resident((H, H)),          # w_th, grid-constant
        ],
        out_specs=(
            moving((Tb, Nb, H)),       # hidden-state sequence
            per_shard((Nb, H)),        # h carry / final hidden state
        ),
        out_shape=(
            jax.ShapeDtypeStruct((T_pad, N, H), f32),
            jax.ShapeDtypeStruct((N, H), h0.dtype),
        ),
        compiler_params=pltpu.CompilerParams(
            # batch shards are independent (v7x megacore); time carries state.
            dimension_semantics=("parallel", "arbitrary"),
        ),
        cost_estimate=pl.CostEstimate(
            flops=flops,
            transcendentals=3 * T * N * H,
            bytes_accessed=bytes_accessed,
        ),
    )(gx_zr, gx_t, h0, prep["w_h2"], prep["w_th"])

    h_seq = h_seq[:T]

    # --- 3) Bulk output projection: deferred off the serial critical path. ---
    os = (jnp.dot(h_seq.reshape(T * N, H), prep["wo"],
                  preferred_element_type=f32)
          + prep["bo"]).reshape(T, N, F)
    return os.astype(xs.dtype), h_final


def gru_cell(x, h, prep):
    """Single GRU step (matches GruCell.forward): x [N, F], h [N, H]."""
    os, h_new = gru_sequence(x[None], h, prep, time_block=1)
    return os[0], h_new


# ----------------------------------------------------------------------------
# Deterministic synthetic init (PyTorch nn.Linear shapes) + pure-JAX reference.
# ----------------------------------------------------------------------------
def init_params(key, dim_feature, dim_hidden):
    ks = jax.random.split(key, 8)
    d_in = dim_hidden + dim_feature
    sg = 1.0 / jnp.sqrt(d_in)
    so = 1.0 / jnp.sqrt(dim_hidden)
    u = lambda k, shape, s: jax.random.uniform(
        k, shape, dtype=jnp.float32, minval=-s, maxval=s)
    return {
        "w_reset": u(ks[0], (dim_hidden, d_in), sg),
        "b_reset": u(ks[1], (dim_hidden,), sg),
        "w_update": u(ks[2], (dim_hidden, d_in), sg),
        "b_update": u(ks[3], (dim_hidden,), sg),
        "w_transform": u(ks[4], (dim_hidden, d_in), sg),
        "b_transform": u(ks[5], (dim_hidden,), sg),
        "w_output": u(ks[6], (dim_feature, dim_hidden), so),
        "b_output": u(ks[7], (dim_feature,), so),
    }


def gru_cell_ref(x, h, p):
    """Pure-JAX mirror of the PyTorch forward (single step)."""
    i = jnp.concatenate([h, x], axis=1)
    z = jax.nn.sigmoid(i @ p["w_reset"].T + p["b_reset"])
    r = jax.nn.sigmoid(i @ p["w_update"].T + p["b_update"])
    joint = jnp.concatenate([r * h, x], axis=1)
    h_hat = jnp.tanh(joint @ p["w_transform"].T + p["b_transform"])
    h_new = (1.0 - z) * h + z * h_hat
    o = h_new @ p["w_output"].T + p["b_output"]
    return o, h_new


if __name__ == "__main__":
    batch = 8
    dim_feature = 16
    dim_hidden = 32
    seq_len = 10       # deliberately NOT a multiple of time_block -> tail guard
    time_block = 4

    key = jax.random.PRNGKey(0)
    k_x, k_h, k_p = jax.random.split(key, 3)

    xs = jax.random.normal(k_x, (seq_len, batch, dim_feature), dtype=jnp.float32)
    h0 = jax.random.normal(k_h, (batch, dim_hidden), dtype=jnp.float32)
    params = init_params(k_p, dim_feature, dim_hidden)

    # One-time prep (weight packing / transpose / dtype), hoisted off the call path.
    prep_f32 = prepare_params(params, dim_feature, dim_hidden,
                              recur_dtype=jnp.float32)
    prep_bf16 = prepare_params(params, dim_feature, dim_hidden)  # bf16 MXU path

    run_seq = jax.jit(functools.partial(gru_sequence, time_block=time_block))

    # Reference: step the pure-JAX single-step forward over the sequence.
    h_ref = h0
    o_ref_list = []
    for t in range(seq_len):
        o_t, h_ref = gru_cell_ref(xs[t], h_ref, params)
        o_ref_list.append(o_t)
    os_ref = jnp.stack(o_ref_list, axis=0)

    # f32 recurrent weights: tight agreement with the module forward.
    os32, hf32 = run_seq(xs, h0, prep_f32)
    jax.block_until_ready((os32, hf32))
    assert os32.shape == (seq_len, batch, dim_feature)
    assert hf32.shape == (batch, dim_hidden)
    assert jnp.allclose(os32, os_ref, atol=1e-4, rtol=1e-4)
    assert jnp.allclose(hf32, h_ref, atol=1e-4, rtol=1e-4)

    # bf16 MXU operands on the recurrent dots (perf config): looser tolerance.
    osbf, hfbf = run_seq(xs, h0, prep_bf16)
    jax.block_until_ready((osbf, hfbf))
    assert jnp.allclose(osbf, os_ref, atol=2e-2, rtol=2e-2)
    assert jnp.allclose(hfbf, h_ref, atol=2e-2, rtol=2e-2)

    # Single-step entry point (T=1), semantics of GruCell.forward.
    o1, h1 = jax.jit(gru_cell)(xs[0], h0, prep_f32)
    jax.block_until_ready((o1, h1))
    o1_ref, h1_ref = gru_cell_ref(xs[0], h0, params)
    assert jnp.allclose(o1, o1_ref, atol=1e-4, rtol=1e-4)
    assert jnp.allclose(h1, h1_ref, atol=1e-4, rtol=1e-4)

    print("KERNEL_OK")
</pallas_src>

<mosaic_0001>
module attributes {stable_mosaic.version = 11 : i64} {
  func.func @_gru_recurrent_kernel(%arg0: i32, %arg1: i32, %arg2: memref<4x8x64xf32, #tpu.memory_space<vmem>>, %arg3: memref<4x8x32xf32, #tpu.memory_space<vmem>>, %arg4: memref<8x32xf32, #tpu.memory_space<vmem>>, %arg5: memref<32x64xf32, #tpu.memory_space<vmem>>, %arg6: memref<32x32xf32, #tpu.memory_space<vmem>>, %arg7: memref<4x8x32xf32, #tpu.memory_space<vmem>>, %arg8: memref<8x32xf32, #tpu.memory_space<vmem>>) attributes {dimension_semantics = [#tpu.dimension_semantics<parallel>, #tpu.dimension_semantics<arbitrary>], iteration_bounds = array<i64: 1, 3>, scalar_prefetch = 0 : i64, scratch_operands = 0 : i64, tpu.core_type = #tpu.core_type<tc>, window_params = [{transform_indices = @transform_0, window_bounds = array<i64: 4, 8, 64>}, {transform_indices = @transform_1, window_bounds = array<i64: 4, 8, 32>}, {transform_indices = @transform_2, window_bounds = array<i64: 8, 32>}, {pipeline_mode = #tpu.pipeline_mode<synchronous>, transform_indices = @transform_3, window_bounds = array<i64: 32, 64>}, {pipeline_mode = #tpu.pipeline_mode<synchronous>, transform_indices = @transform_4, window_bounds = array<i64: 32, 32>}, {transform_indices = @transform_5, window_bounds = array<i64: 4, 8, 32>}, {transform_indices = @transform_6, window_bounds = array<i64: 8, 32>}]} {
    %c0_i32 = arith.constant 0 : i32
    %0 = arith.cmpi eq, %arg1, %c0_i32 : i32
    %1 = arith.extui %0 : i1 to i32
    %c0_i32_0 = arith.constant 0 : i32
    %2 = arith.cmpi ne, %1, %c0_i32_0 : i32
    scf.if %2 {
      %c0_55 = arith.constant 0 : index
      %c0_56 = arith.constant 0 : index
      %135 = vector.load %arg4[%c0_55, %c0_56] : memref<8x32xf32, #tpu.memory_space<vmem>>, vector<8x32xf32>
      %c0_57 = arith.constant 0 : index
      %c0_58 = arith.constant 0 : index
      %136 = vector.load %arg8[%c0_57, %c0_58] : memref<8x32xf32, #tpu.memory_space<vmem>>, vector<8x32xf32>
      tpu.vector_store %arg8[%c0_57, %c0_58], %135 {strides = array<i32>} : memref<8x32xf32, #tpu.memory_space<vmem>>, vector<8x32xf32>,
    } else {
    }
    %c0 = arith.constant 0 : index
    %c0_1 = arith.constant 0 : index
    %3 = vector.load %arg5[%c0, %c0_1] : memref<32x64xf32, #tpu.memory_space<vmem>>, vector<32x64xf32>
    %c0_2 = arith.constant 0 : index
    %c0_3 = arith.constant 0 : index
    %4 = vector.load %arg6[%c0_2, %c0_3] : memref<32x32xf32, #tpu.memory_space<vmem>>, vector<32x32xf32>
    %c0_4 = arith.constant 0 : index
    %c0_5 = arith.constant 0 : index
    %5 = vector.load %arg8[%c0_4, %c0_5] : memref<8x32xf32, #tpu.memory_space<vmem>>, vector<8x32xf32>
    %c0_i32_6 = arith.constant 0 : i32
    %6 = arith.index_cast %c0_i32_6 : i32 to index
    %c0_7 = arith.constant 0 : index
    %c0_8 = arith.constant 0 : index
    %7 = vector.load %arg2[%6, %c0_7, %c0_8] : memref<4x8x64xf32, #tpu.memory_space<vmem>>, vector<1x8x64xf32>
    %8 = vector.shape_cast %7 : vector<1x8x64xf32> to vector<8x64xf32>
    %cst = arith.constant dense<0.000000e+00> : vector<8x64xf32>
    %9 = tpu.matmul %5, %3, %cst {dimension_numbers = #tpu.dot_dimension_numbers<[1], [0], [0], [1], [0, 0, 1, 1], [], []>} : vector<8x32xf32>, vector<32x64xf32>, vector<8x64xf32> -> vector<8x64xf32>
    %10 = arith.addf %8, %9 : vector<8x64xf32>
    %11 = arith.negf %10 : vector<8x64xf32>
    %12 = math.exp %11 : vector<8x64xf32>
    %cst_9 = arith.constant 1.000000e+00 : f32
    %13 = vector.broadcast %cst_9 : f32 to vector<8x64xf32>
    %14 = arith.addf %13, %12 : vector<8x64xf32>
    %15 = arith.divf %13, %14 : vector<8x64xf32>
    %16 = vector.extract_strided_slice %15 {offsets = [0, 0], sizes = [8, 32], strides = [1, 1]} : vector<8x64xf32> to vector<8x32xf32>
    %17 = vector.extract_strided_slice %15 {offsets = [0, 32], sizes = [8, 32], strides = [1, 1]} : vector<8x64xf32> to vector<8x32xf32>
    %18 = arith.index_cast %c0_i32_6 : i32 to index
    %c0_10 = arith.constant 0 : index
    %c0_11 = arith.constant 0 : index
    %19 = vector.load %arg3[%18, %c0_10, %c0_11] : memref<4x8x32xf32, #tpu.memory_space<vmem>>, vector<1x8x32xf32>
    %20 = vector.shape_cast %19 : vector<1x8x32xf32> to vector<8x32xf32>
    %21 = arith.mulf %17, %5 : vector<8x32xf32>
    %cst_12 = arith.constant dense<0.000000e+00> : vector<8x32xf32>
    %22 = tpu.matmul %21, %4, %cst_12 {dimension_numbers = #tpu.dot_dimension_numbers<[1], [0], [0], [1], [0, 0, 1, 1], [], []>} : vector<8x32xf32>, vector<32x32xf32>, vector<8x32xf32> -> vector<8x32xf32>
    %23 = arith.addf %20, %22 : vector<8x32xf32>
    %24 = math.tanh %23 : vector<8x32xf32>
    %cst_13 = arith.constant 1.000000e+00 : f32
    %25 = vector.broadcast %cst_13 : f32 to vector<8x32xf32>
    %26 = arith.subf %25, %16 : vector<8x32xf32>
    %27 = arith.mulf %26, %5 : vector<8x32xf32>
    %28 = arith.mulf %16, %24 : vector<8x32xf32>
    %29 = arith.addf %27, %28 : vector<8x32xf32>
    %c4_i32 = arith.constant 4 : i32
    %30 = arith.muli %arg1, %c4_i32 : i32
    %31 = arith.addi %30, %c0_i32_6 : i32
    %c10_i32 = arith.constant 10 : i32
    %32 = arith.cmpi slt, %31, %c10_i32 : i32
    %33 = arith.select %32, %29, %5 : vector<8x32xf32>
    %34 = arith.index_cast %c0_i32_6 : i32 to index
    %c0_14 = arith.constant 0 : index
    %c0_15 = arith.constant 0 : index
    %35 = vector.load %arg7[%34, %c0_14, %c0_15] : memref<4x8x32xf32, #tpu.memory_space<vmem>>, vector<1x8x32xf32>
    %36 = vector.shape_cast %35 : vector<1x8x32xf32> to vector<8x32xf32>
    %37 = vector.shape_cast %33 : vector<8x32xf32> to vector<1x8x32xf32>
    tpu.vector_store %arg7[%34, %c0_14, %c0_15], %37 {strides = array<i32>} : memref<4x8x32xf32, #tpu.memory_space<vmem>>, vector<1x8x32xf32>,
    %c1_i32 = arith.constant 1 : i32
    %38 = arith.index_cast %c1_i32 : i32 to index
    %c0_16 = arith.constant 0 : index
    %c0_17 = arith.constant 0 : index
    %39 = vector.load %arg2[%38, %c0_16, %c0_17] : memref<4x8x64xf32, #tpu.memory_space<vmem>>, vector<1x8x64xf32>
    %40 = vector.shape_cast %39 : vector<1x8x64xf32> to vector<8x64xf32>
    %cst_18 = arith.constant dense<0.000000e+00> : vector<8x64xf32>
    %41 = tpu.matmul %33, %3, %cst_18 {dimension_numbers = #tpu.dot_dimension_numbers<[1], [0], [0], [1], [0, 0, 1, 1], [], []>} : vector<8x32xf32>, vector<32x64xf32>, vector<8x64xf32> -> vector<8x64xf32>
    %42 = arith.addf %40, %41 : vector<8x64xf32>
    %43 = arith.negf %42 : vector<8x64xf32>
    %44 = math.exp %43 : vector<8x64xf32>
    %cst_19 = arith.constant 1.000000e+00 : f32
    %45 = vector.broadcast %cst_19 : f32 to vector<8x64xf32>
    %46 = arith.addf %45, %44 : vector<8x64xf32>
    %47 = arith.divf %45, %46 : vector<8x64xf32>
    %48 = vector.extract_strided_slice %47 {offsets = [0, 0], sizes = [8, 32], strides = [1, 1]} : vector<8x64xf32> to vector<8x32xf32>
    %49 = vector.extract_strided_slice %47 {offsets = [0, 32], sizes = [8, 32], strides = [1, 1]} : vector<8x64xf32> to vector<8x32xf32>
    %50 = arith.index_cast %c1_i32 : i32 to index
    %c0_20 = arith.constant 0 : index
    %c0_21 = arith.constant 0 : index
    %51 = vector.load %arg3[%50, %c0_20, %c0_21] : memref<4x8x32xf32, #tpu.memory_space<vmem>>, vector<1x8x32xf32>
    %52 = vector.shape_cast %51 : vector<1x8x32xf32> to vector<8x32xf32>
    %53 = arith.mulf %49, %33 : vector<8x32xf32>
    %cst_22 = arith.constant dense<0.000000e+00> : vector<8x32xf32>
    %54 = tpu.matmul %53, %4, %cst_22 {dimension_numbers = #tpu.dot_dimension_numbers<[1], [0], [0], [1], [0, 0, 1, 1], [], []>} : vector<8x32xf32>, vector<32x32xf32>, vector<8x32xf32> -> vector<8x32xf32>
    %55 = arith.addf %52, %54 : vector<8x32xf32>
    %56 = math.tanh %55 : vector<8x32xf32>
    %cst_23 = arith.constant 1.000000e+00 : f32
    %57 = vector.broadcast %cst_23 : f32 to vector<8x32xf32>
    %58 = arith.subf %57, %48 : vector<8x32xf32>
    %59 = arith.mulf %58, %33 : vector<8x32xf32>
    %60 = arith.mulf %48, %56 : vector<8x32xf32>
    %61 = arith.addf %59, %60 : vector<8x32xf32>
    %c4_i32_24 = arith.constant 4 : i32
    %62 = arith.muli %arg1, %c4_i32_24 : i32
    %63 = arith.addi %62, %c1_i32 : i32
    %c10_i32_25 = arith.constant 10 : i32
    %64 = arith.cmpi slt, %63, %c10_i32_25 : i32
    %65 = arith.select %64, %61, %33 : vector<8x32xf32>
    %66 = arith.index_cast %c1_i32 : i32 to index
    %c0_26 = arith.constant 0 : index
    %c0_27 = arith.constant 0 : index
    %67 = vector.load %arg7[%66, %c0_26, %c0_27] : memref<4x8x32xf32, #tpu.memory_space<vmem>>, vector<1x8x32xf32>
    %68 = vector.shape_cast %67 : vector<1x8x32xf32> to vector<8x32xf32>
    %69 = vector.shape_cast %65 : vector<8x32xf32> to vector<1x8x32xf32>
    tpu.vector_store %arg7[%66, %c0_26, %c0_27], %69 {strides = array<i32>} : memref<4x8x32xf32, #tpu.memory_space<vmem>>, vector<1x8x32xf32>,
    %c2_i32 = arith.constant 2 : i32
    %70 = arith.index_cast %c2_i32 : i32 to index
    %c0_28 = arith.constant 0 : index
    %c0_29 = arith.constant 0 : index
    %71 = vector.load %arg2[%70, %c0_28, %c0_29] : memref<4x8x64xf32, #tpu.memory_space<vmem>>, vector<1x8x64xf32>
    %72 = vector.shape_cast %71 : vector<1x8x64xf32> to vector<8x64xf32>
    %cst_30 = arith.constant dense<0.000000e+00> : vector<8x64xf32>
    %73 = tpu.matmul %65, %3, %cst_30 {dimension_numbers = #tpu.dot_dimension_numbers<[1], [0], [0], [1], [0, 0, 1, 1], [], []>} : vector<8x32xf32>, vector<32x64xf32>, vector<8x64xf32> -> vector<8x64xf32>
    %74 = arith.addf %72, %73 : vector<8x64xf32>
    %75 = arith.negf %74 : vector<8x64xf32>
    %76 = math.exp %75 : vector<8x64xf32>
    %cst_31 = arith.constant 1.000000e+00 : f32
    %77 = vector.broadcast %cst_31 : f32 to vector<8x64xf32>
    %78 = arith.addf %77, %76 : vector<8x64xf32>
    %79 = arith.divf %77, %78 : vector<8x64xf32>
    %80 = vector.extract_strided_slice %79 {offsets = [0, 0], sizes = [8, 32], strides = [1, 1]} : vector<8x64xf32> to vector<8x32xf32>
    %81 = vector.extract_strided_slice %79 {offsets = [0, 32], sizes = [8, 32], strides = [1, 1]} : vector<8x64xf32> to vector<8x32xf32>
    %82 = arith.index_cast %c2_i32 : i32 to index
    %c0_32 = arith.constant 0 : index
    %c0_33 = arith.constant 0 : index
    %83 = vector.load %arg3[%82, %c0_32, %c0_33] : memref<4x8x32xf32, #tpu.memory_space<vmem>>, vector<1x8x32xf32>
    %84 = vector.shape_cast %83 : vector<1x8x32xf32> to vector<8x32xf32>
    %85 = arith.mulf %81, %65 : vector<8x32xf32>
    %cst_34 = arith.constant dense<0.000000e+00> : vector<8x32xf32>
    %86 = tpu.matmul %85, %4, %cst_34 {dimension_numbers = #tpu.dot_dimension_numbers<[1], [0], [0], [1], [0, 0, 1, 1], [], []>} : vector<8x32xf32>, vector<32x32xf32>, vector<8x32xf32> -> vector<8x32xf32>
    %87 = arith.addf %84, %86 : vector<8x32xf32>
    %88 = math.tanh %87 : vector<8x32xf32>
    %cst_35 = arith.constant 1.000000e+00 : f32
    %89 = vector.broadcast %cst_35 : f32 to vector<8x32xf32>
    %90 = arith.subf %89, %80 : vector<8x32xf32>
    %91 = arith.mulf %90, %65 : vector<8x32xf32>
    %92 = arith.mulf %80, %88 : vector<8x32xf32>
    %93 = arith.addf %91, %92 : vector<8x32xf32>
    %c4_i32_36 = arith.constant 4 : i32
    %94 = arith.muli %arg1, %c4_i32_36 : i32
    %95 = arith.addi %94, %c2_i32 : i32
    %c10_i32_37 = arith.constant 10 : i32
    %96 = arith.cmpi slt, %95, %c10_i32_37 : i32
    %97 = arith.select %96, %93, %65 : vector<8x32xf32>
    %98 = arith.index_cast %c2_i32 : i32 to index
    %c0_38 = arith.constant 0 : index
    %c0_39 = arith.constant 0 : index
    %99 = vector.load %arg7[%98, %c0_38, %c0_39] : memref<4x8x32xf32, #tpu.memory_space<vmem>>, vector<1x8x32xf32>
    %100 = vector.shape_cast %99 : vector<1x8x32xf32> to vector<8x32xf32>
    %101 = vector.shape_cast %97 : vector<8x32xf32> to vector<1x8x32xf32>
    tpu.vector_store %arg7[%98, %c0_38, %c0_39], %101 {strides = array<i32>} : memref<4x8x32xf32, #tpu.memory_space<vmem>>, vector<1x8x32xf32>,
    %c3_i32 = arith.constant 3 : i32
    %102 = arith.index_cast %c3_i32 : i32 to index
    %c0_40 = arith.constant 0 : index
    %c0_41 = arith.constant 0 : index
    %103 = vector.load %arg2[%102, %c0_40, %c0_41] : memref<4x8x64xf32, #tpu.memory_space<vmem>>, vector<1x8x64xf32>
    %104 = vector.shape_cast %103 : vector<1x8x64xf32> to vector<8x64xf32>
    %cst_42 = arith.constant dense<0.000000e+00> : vector<8x64xf32>
    %105 = tpu.matmul %97, %3, %cst_42 {dimension_numbers = #tpu.dot_dimension_numbers<[1], [0], [0], [1], [0, 0, 1, 1], [], []>} : vector<8x32xf32>, vector<32x64xf32>, vector<8x64xf32> -> vector<8x64xf32>
    %106 = arith.addf %104, %105 : vector<8x64xf32>
    %107 = arith.negf %106 : vector<8x64xf32>
    %108 = math.exp %107 : vector<8x64xf32>
    %cst_43 = arith.constant 1.000000e+00 : f32
    %109 = vector.broadcast %cst_43 : f32 to vector<8x64xf32>
    %110 = arith.addf %109, %108 : vector<8x64xf32>
    %111 = arith.divf %109, %110 : vector<8x64xf32>
    %112 = vector.extract_strided_slice %111 {offsets = [0, 0], sizes = [8, 32], strides = [1, 1]} : vector<8x64xf32> to vector<8x32xf32>
    %113 = vector.extract_strided_slice %111 {offsets = [0, 32], sizes = [8, 32], strides = [1, 1]} : vector<8x64xf32> to vector<8x32xf32>
    %114 = arith.index_cast %c3_i32 : i32 to index
    %c0_44 = arith.constant 0 : index
    %c0_45 = arith.constant 0 : index
    %115 = vector.load %arg3[%114, %c0_44, %c0_45] : memref<4x8x32xf32, #tpu.memory_space<vmem>>, vector<1x8x32xf32>
    %116 = vector.shape_cast %115 : vector<1x8x32xf32> to vector<8x32xf32>
    %117 = arith.mulf %113, %97 : vector<8x32xf32>
    %cst_46 = arith.constant dense<0.000000e+00> : vector<8x32xf32>
    %118 = tpu.matmul %117, %4, %cst_46 {dimension_numbers = #tpu.dot_dimension_numbers<[1], [0], [0], [1], [0, 0, 1, 1], [], []>} : vector<8x32xf32>, vector<32x32xf32>, vector<8x32xf32> -> vector<8x32xf32>
    %119 = arith.addf %116, %118 : vector<8x32xf32>
    %120 = math.tanh %119 : vector<8x32xf32>
    %cst_47 = arith.constant 1.000000e+00 : f32
    %121 = vector.broadcast %cst_47 : f32 to vector<8x32xf32>
    %122 = arith.subf %121, %112 : vector<8x32xf32>
    %123 = arith.mulf %122, %97 : vector<8x32xf32>
    %124 = arith.mulf %112, %120 : vector<8x32xf32>
    %125 = arith.addf %123, %124 : vector<8x32xf32>
    %c4_i32_48 = arith.constant 4 : i32
    %126 = arith.muli %arg1, %c4_i32_48 : i32
    %127 = arith.addi %126, %c3_i32 : i32
    %c10_i32_49 = arith.constant 10 : i32
    %128 = arith.cmpi slt, %127, %c10_i32_49 : i32
    %129 = arith.select %128, %125, %97 : vector<8x32xf32>
    %130 = arith.index_cast %c3_i32 : i32 to index
    %c0_50 = arith.constant 0 : index
    %c0_51 = arith.constant 0 : index
    %131 = vector.load %arg7[%130, %c0_50, %c0_51] : memref<4x8x32xf32, #tpu.memory_space<vmem>>, vector<1x8x32xf32>
    %132 = vector.shape_cast %131 : vector<1x8x32xf32> to vector<8x32xf32>
    %133 = vector.shape_cast %129 : vector<8x32xf32> to vector<1x8x32xf32>
    tpu.vector_store %arg7[%130, %c0_50, %c0_51], %133 {strides = array<i32>} : memref<4x8x32xf32, #tpu.memory_space<vmem>>, vector<1x8x32xf32>,
    %c4_i32_52 = arith.constant 4 : i32
    %c0_53 = arith.constant 0 : index
    %c0_54 = arith.constant 0 : index
    %134 = vector.load %arg8[%c0_53, %c0_54] : memref<8x32xf32, #tpu.memory_space<vmem>>, vector<8x32xf32>
    tpu.vector_store %arg8[%c0_53, %c0_54], %129 {strides = array<i32>} : memref<8x32xf32, #tpu.memory_space<vmem>>, vector<8x32xf32>,
    return
  }
  func.func @transform_0(%arg0: i32, %arg1: i32) -> (i32, i32, i32) {
    %c0_i32 = arith.constant 0 : i32
    %c0_i32_0 = arith.constant 0 : i32
    return %arg1, %arg0, %c0_i32 : i32, i32, i32
  }
  func.func @transform_1(%arg0: i32, %arg1: i32) -> (i32, i32, i32) {
    %c0_i32 = arith.constant 0 : i32
    %c0_i32_0 = arith.constant 0 : i32
    return %arg1, %arg0, %c0_i32 : i32, i32, i32
  }
  func.func @transform_2(%arg0: i32, %arg1: i32) -> (i32, i32) {
    %c0_i32 = arith.constant 0 : i32
    %c0_i32_0 = arith.constant 0 : i32
    return %arg0, %c0_i32 : i32, i32
  }
  func.func @transform_3(%arg0: i32, %arg1: i32) -> (i32, i32) {
    %c0_i32 = arith.constant 0 : i32
    %c0_i32_0 = arith.constant 0 : i32
    %c0_i32_1 = arith.constant 0 : i32
    return %c0_i32, %c0_i32_0 : i32, i32
  }
  func.func @transform_4(%arg0: i32, %arg1: i32) -> (i32, i32) {
    %c0_i32 = arith.constant 0 : i32
    %c0_i32_0 = arith.constant 0 : i32
    %c0_i32_1 = arith.constant 0 : i32
    return %c0_i32, %c0_i32_0 : i32, i32
  }
  func.func @transform_5(%arg0: i32, %arg1: i32) -> (i32, i32, i32) {
    %c0_i32 = arith.constant 0 : i32
    %c0_i32_0 = arith.constant 0 : i32
    return %arg1, %arg0, %c0_i32 : i32, i32, i32
  }
  func.func @transform_6(%arg0: i32, %arg1: i32) -> (i32, i32) {
    %c0_i32 = arith.constant 0 : i32
    %c0_i32_0 = arith.constant 0 : i32
    return %arg0, %c0_i32 : i32, i32
  }
}

</mosaic_0001>

<bundles_post_ra>
// kernel: gru_sequence.1
= control target key start
LH: loop header
LB: loop body
LE: loop exit
PB: predicated region body
PF: predicated region fallthrough
CT: control target
= control target key end

     0   :  { %12 = vsyncpa [#allocation3], 0  ;;  %s1043_s21 = smov 0   ;;  %s1045_s22 = smov 0   ;;  %s1165_s0 = inlined_call_operand.vmem [shape: f32[12,8,64], index: 0, kind: input, shape index: {}]   ;;  %s1166_s1 = inlined_call_operand.vmem [shape: f32[12,8,32], index: 1, kind: input, shape index: {}]   ;;  %s1167_s2 = inlined_call_operand.vmem [shape: f32[8,32], index: 2, kind: input, shape index: {}]   ;;  %s1168_s3 = inlined_call_operand.vmem [shape: f32[32,64], index: 3, kind: input, shape index: {}]   ;;  %s1169_s4 = inlined_call_operand.vmem [shape: f32[32,32], index: 4, kind: input, shape index: {}]   ;;  %s1170_s5 = inlined_call_operand.vmem [shape: f32[12,8,32], index: 5, kind: output, shape index: {0}]   ;;  %s1171_s6 = inlined_call_operand.hbm [shape: f32[8,32], index: 6, kind: output, shape index: {1}]  }
   0x1   :  { %s1047_s23 = smov 0  }
   0x2 LB: > { %s853_s24 = sadd.s32 4294967295, %s1003_s23   ;;  %s27_s25 = sadd.s32 1, %s999_s22  ;;  %s1003_s23 = sphi %s1047_s23, %s18_s23   ;;  %s999_s22 = sphi %s1045_s22, %s1173_s22   ;;  %s995_s21 = sphi %s1043_s21, %s1172_s21  }
   0x3   : > { %p28_p0 = scmp.ge.s32.totalorder %s27_s25, 3  ;;  %p858_p1 = scmp.ge.s32.totalorder %s1003_s23, 1 }
   0x4   : > { %p261_p2 = scmp.lt.s32.totalorder %s1003_s23, 4 }
   0x5   : > { %s1175_s25 = smov (%p28_p0, %s27_s25), 0 }
   0x6   : > { %p262_p3 = pnand %p858_p1, %p261_p2 }
   0x7   : > { %s1062_s26 = sshll.u32 (!%p262_p3), %s995_s21, 2  ;;  %p865_p5 = scmp.ne.s32.totalorder (!%p262_p3), %s995_s21, 0 }
   0x8   : > { %265 = sbr.rel (%p262_p3) target bundleno = 1686 (0x696), region = 40  ;;  %p310_p4 = scmp.lt.s32.totalorder (!%p262_p3), %s1062_s26, 11 }
   0xd   : > { %s311_s27 = scalar_select %p310_p4, %s1062_s26, 11 }
   0xe   : > { %343 = sbr.rel (%p865_p5) target bundleno = 21 (0x15), region = 44 }
   0xf   : > { %s860_s28 = sshll.u32 %s311_s27, 3 }
  0x10   : > { %s1069_s7 = scalar_lea.vmem %s1165_s0, %s860_s28  ;;  %s1074_s10 = scalar_lea.vmem %s1166_s1, %s860_s28 }
  0x11   : > { %s1079_s13 = scalar_lea.vmem %s1170_s5, %s860_s28 }
  0x13   : > { %v344_v0 = vld [vmem:[%s1167_s2] sm:$0xff]  ;;  %vm345_vm0 = vcmask 261120  }
  0x14   : > { %346 = vst.msk [vmem:[#allocation2] sm:$0xff] %vm345_vm0, %v344_v0 }
  0x15 PF: > { %v350_v1 = vld [vmem:[%s1168_s3 + $0x18] sm:$0xff]  ;;  %v349_v2 = vld [vmem:[%s1168_s3 + $0x10] sm:$0xff]  ;;  %v348_v4 = vld [vmem:[%s1168_s3 + $0x8] sm:$0xff]  ;;  %s1005_s27 = smov 32   ;;  %vm357_vm1 = vcmask 261120   ;;  %s1006_s17 = smov 96  }
  0x16   : > { %373 = vmatpush.msra.mxu0 %v350_v1  ;;  %461 = vmatpush.msra.mxu2 %v350_v1  ;;  %v347_v5 = vld [vmem:[%s1168_s3] sm:$0xff]  ;;  %v354_v9 = vld [vmem:[%s1169_s4 + $0x18] sm:$0xff]  ;;  %v353_v10 = vld [vmem:[%s1169_s4 + $0x10] sm:$0xff]  ;;  %p438_p6 = scmp.lt.s32.totalorder %s1062_s26, 10  ;;  %s526_s19 = sadd.s32 1, %s1062_s26 }
  0x17   : > { %v356_v6 = vld [vmem:[%s1069_s7] sm:$0xff]  ;;  %423 = vmatpush.msra.mxu1 %v354_v9  ;;  %512 = vmatpush.msra.mxu3 %v354_v9  ;;  %v352_v12 = vld [vmem:[%s1169_s4 + $0x8] sm:$0xff]  ;;  %p527_p7 = scmp.lt.s32.totalorder %s526_s19, 10  ;;  %s616_s21 = sadd.s32 2, %s1062_s26 }
  0x18   : > { %374 = vmatpush.msra.mxu0 %v349_v2  ;;  %462 = vmatpush.msra.mxu2 %v349_v2  ;;  %v351_v13 = vld [vmem:[%s1169_s4] sm:$0xff]  ;;  %s439_s18 = scalar_select %p438_p6, 1, 0  ;;  %v870_v39 = vld [vmem:[%s1069_s7 + $0x8] sm:$0xff] }
  0x19   : > { %424 = vmatpush.msra.mxu1 %v353_v10  ;;  %513 = vmatpush.msra.mxu3 %v353_v10  ;;  %v401_v29 = vld [vmem:[%s1074_s10] sm:$0xff]  ;;  %v873_v58 = vld [vmem:[%s1074_s10 + $0x8] sm:$0xff]  ;;  %s528_s20 = scalar_select %p527_p7, 1, 0 }
  0x1a   : > { %375 = vmatpush.msra.mxu0 %v348_v4  ;;  %463 = vmatpush.msra.mxu2 %v348_v4  ;;  %v440_v33 = vstv %s439_s18  ;;  %p617_p8 = scmp.lt.s32.totalorder %s616_s21, 10  ;;  %s1007_s29 = smov [#allocation2]  }
  0x1b   : > { %v1090_v3 = vld [vmem:[#allocation2] sm:$0xff]  ;;  %425 = vmatpush.msra.mxu1 %v352_v12  ;;  %514 = vmatpush.msra.mxu3 %v352_v12  ;;  %vm441_vm6 = vcmp.eq.s32.totalorder %v440_v33, 1  ;;  %v529_v62 = vstv %s528_s20  ;;  %v882_v33 = vld [vmem:[%s1069_s7 + $0x18] sm:$0xff]  ;;  %s735_s30 = sshll.u32 %s1007_s29, 4  ;;  %p896_p10 = scmp.eq.s32.totalorder %s853_s24, 2  ;;  %s736_s30 = int_to_ptr.vmem [resolvable:$true] %s735_s30 }
  0x1c   : > { %402 = vrot.lane.b32.xlu0 %v1090_v3, %s1005_s27  ;;  %376 = vmatpush.msra.mxu0 %v347_v5  ;;  %vm530_vm11 = vcmp.eq.s32.totalorder %v529_v62, 1  ;;  %s618_s28 = scalar_select %p617_p8, 1, 0 }
  0x1d   : > { %464 = vmatpush.msra.mxu2 %v347_v5  ;;  %866 = vmatmul.msk.f32.vlgmr.msra.gmra.mxu0 %vm357_vm1, %v1090_v3 }
  0x1e   : > { %551 = vmatpush.msrb.mxu0 %v350_v1  ;;  %426 = vmatpush.msra.mxu1 %v351_v13 }
  0x1f   : > { %641 = vmatpush.msrb.mxu2 %v350_v1  ;;  %515 = vmatpush.msra.mxu3 %v351_v13 }
  0x20   : > { %552 = vmatpush.msrb.mxu0 %v349_v2  ;;  %602 = vmatpush.msrb.mxu1 %v354_v9 }
  0x21   : > { %642 = vmatpush.msrb.mxu2 %v349_v2  ;;  %692 = vmatpush.msrb.mxu3 %v354_v9 }
  0x22   : > { %553 = vmatpush.msrb.mxu0 %v348_v4  ;;  %603 = vmatpush.msrb.mxu1 %v353_v10 }
  0x23   : > { %643 = vmatpush.msrb.mxu2 %v348_v4  ;;  %693 = vmatpush.msrb.mxu3 %v353_v10  ;;  %v876_v4 = vld [vmem:[%s1069_s7 + $0x10] sm:$0xff]  ;;  %s706_s7 = sadd.s32 3, %s1062_s26  ;;  %s737_s26 = sshll.u32 %s1171_s6, 4  ;;  %s738_s26 = int_to_ptr.hbm [resolvable:$true] %s737_s26 }
  0x24   : > { %554 = vmatpush.msrb.mxu0 %v347_v5  ;;  %604 = vmatpush.msrb.mxu1 %v352_v12  ;;  %p707_p9 = scmp.lt.s32.totalorder %s706_s7, 10 }
  0x25   : > { %644 = vmatpush.msrb.mxu2 %v347_v5  ;;  %694 = vmatpush.msrb.mxu3 %v352_v12 }
  0x26   : > { %605 = vmatpush.msrb.mxu1 %v351_v13 }
  0x27   : > { %695 = vmatpush.msrb.mxu3 %v351_v13 }
  0x8e   : > { %v403_v23 = vpop.permute.xlu0 %402 }
  0x9a   : > { %v378_v7 = vpop.f32.mrf.mxu0 }
  0x9b   : > { %v381_v8 = vadd.f32 %v378_v7, %v356_v6 }
  0x9d   : > { %v867_v11 = vmul.f32 -1.442695, %v381_v8 }
  0x9f   : > { %925 = vpow2.f32 %v867_v11 }
  0xa5   : > { %v926_v14 = vpop.eup %925 }
  0xa6   : > { %v385_v15 = vadd.f32 1.0, %v926_v14 }
  0xa8   : > { %927 = vrcp.f32 %v385_v15  ;;  %v397_v19 = vand.u32 2147483648, %v385_v15  ;;  %v395_v21 = vand.u32 2147483647, %v385_v15  ;;  %vm391_vm3 = vweird.f32 %v385_v15 }
  0xaa   : > { %v398_v24 = vor.u32 1.1754944e-38, %v397_v19  ;;  %vm396_vm5 = vcmp.eq.f32.partialorder %v395_v21, 8.507059e+37 }
  0xae   : > { %v928_v16 = vpop.eup %927 }
  0xaf   : > { %v387_v17 = vmul.f32 %v928_v16, %v385_v15  ;;  %vm392_vm2 = vweird.f32 %v928_v16 }
  0xb0   : > { %vm393_vm4 = vmor %vm391_vm3, %vm392_vm2 }
  0xb1   : > { %v388_v18 = vsub.f32 1.0, %v387_v17 }
  0xb3   : > { %v389_v20 = vmul.f32 %v928_v16, %v388_v18 }
  0xb5   : > { %v390_v22 = vadd.f32 %v928_v16, %v389_v20 }
  0xb7   : > { %v394_v25 = vsel %vm393_vm4, %v928_v16, %v390_v22 }
  0xb8   : > { %v399_v26 = vsel %vm396_vm5, %v398_v24, %v394_v25 }
  0xb9   : > { %v405_v27 = vmul.f32 %v403_v23, %v399_v26  ;;  %v433_v32 = vsub.f32 1.0, %v399_v26  ;;  %v879_v23 = vld [vmem:[%s1074_s10 + $0x10] sm:$0xff] }
  0xbb   : > { %407 = vrot.lane.b32.xlu0 %v405_v27, %s1006_s17  ;;  %v434_v35 = vmul.f32 %v433_v32, %v1090_v3  ;;  %v619_v27 = vstv %s618_s28 }
  0xbc   : > { %vm620_vm0 = vcmp.eq.s32.totalorder %v619_v27, 1 }
 0x12d   : > { %v408_v28 = vpop.permute.xlu0 %407 }
 0x12e   : > { %868 = vmatmul.msk.f32.vlgmr.msra.gmra.mxu1 %vm357_vm1, %v408_v28 }
 0x1ab   : > { %v428_v30 = vpop.f32.mrf.mxu1 }
 0x1ac   : > { %v431_v31 = vadd.f32 %v428_v30, %v401_v29 }
 0x1ae   : > { %929 = vtanh.f32 %v431_v31 }
 0x1b4   : > { %v930_v34 = vpop.eup %929 }
 0x1b5   : > { %v435_v36 = vmul.f32 %v930_v34, %v399_v26 }
 0x1b7   : > { %v436_v37 = vadd.f32 %v435_v36, %v434_v35 }
 0x1b9   : > { %v442_v38 = vsel %vm441_vm6, %v436_v37, %v1090_v3 }
 0x1ba   : > { %491 = vrot.lane.b32.xlu1 %v442_v38, %s1005_s27  ;;  %443 = vst.msk [vmem:[%s1079_s13] sm:$0xff] %vm357_vm1, %v442_v38  ;;  %871 = vmatmul.msk.f32.vlgmr.msra.gmra.mxu2 %vm357_vm1, %v442_v38 }
 0x22c   : > { %v492_v54 = vpop.permute.xlu1 %491 }
 0x23d   : > { %v466_v40 = vpop.f32.mrf.mxu2 }
 0x23e   : > { %v469_v41 = vadd.f32 %v870_v39, %v466_v40 }
 0x240   : > { %v872_v42 = vmul.f32 -1.442695, %v469_v41 }
 0x242   : > { %931 = vpow2.f32 %v872_v42 }
 0x248   : > { %v932_v43 = vpop.eup %931 }
 0x249   : > { %v473_v44 = vadd.f32 1.0, %v932_v43 }
 0x24b   : > { %933 = vrcp.f32 %v473_v44  ;;  %v485_v48 = vand.u32 2147483648, %v473_v44  ;;  %v483_v50 = vand.u32 2147483647, %v473_v44  ;;  %vm479_vm8 = vweird.f32 %v473_v44 }
 0x24d   : > { %v486_v52 = vor.u32 1.1754944e-38, %v485_v48  ;;  %vm484_vm10 = vcmp.eq.f32.partialorder %v483_v50, 8.507059e+37 }
 0x251   : > { %v934_v45 = vpop.eup %933 }
 0x252   : > { %v475_v46 = vmul.f32 %v934_v45, %v473_v44  ;;  %vm480_vm7 = vweird.f32 %v934_v45 }
 0x253   : > { %vm481_vm9 = vmor %vm479_vm8, %vm480_vm7 }
 0x254   : > { %v476_v47 = vsub.f32 1.0, %v475_v46 }
 0x256   : > { %v477_v49 = vmul.f32 %v934_v45, %v476_v47 }
 0x258   : > { %v478_v51 = vadd.f32 %v934_v45, %v477_v49 }
 0x25a   : > { %v482_v53 = vsel %vm481_vm9, %v934_v45, %v478_v51 }
 0x25b   : > { %v487_v55 = vsel %vm484_vm10, %v486_v52, %v482_v53  ;;  %v885_v52 = vld [vmem:[%s1074_s10 + $0x18] sm:$0xff] }
 0x25c   : > { %v494_v56 = vmul.f32 %v492_v54, %v487_v55  ;;  %v522_v61 = vsub.f32 1.0, %v487_v55 }
 0x25e   : > { %496 = vrot.lane.b32.xlu1 %v494_v56, %s1006_s17  ;;  %v523_v0 = vmul.f32 %v522_v61, %v442_v38 }
 0x2d0   : > { %v497_v57 = vpop.permute.xlu1 %496 }
 0x2d1   : > { %874 = vmatmul.msk.f32.vlgmr.msra.gmra.mxu3 %vm357_vm1, %v497_v57 }
 0x354   : > { %v517_v59 = vpop.f32.mrf.mxu3 }
 0x355   : > { %v520_v60 = vadd.f32 %v873_v58, %v517_v59 }
 0x357   : > { %935 = vtanh.f32 %v520_v60 }
 0x35d   : > { %v936_v63 = vpop.eup %935 }
 0x35e   : > { %v524_v1 = vmul.f32 %v936_v63, %v487_v55 }
 0x360   : > { %v525_v2 = vadd.f32 %v524_v1, %v523_v0 }
 0x362   : > { %v531_v3 = vsel %vm530_vm11, %v525_v2, %v442_v38 }
 0x363   : > { %581 = vrot.lane.b32.xlu2 %v531_v3, %s1005_s27  ;;  %875 = vst.msk [vmem:[%s1079_s13 + $0x8] sm:$0xff] %vm357_vm1, %v531_v3  ;;  %877 = vmatmul.msk.f32.vlgmr.msrb.gmra.mxu0 %vm357_vm1, %v531_v3 }
 0x3bd   : > { %v582_v19 = vpop.permute.xlu2 %581 }
 0x3e0   : > { %v556_v5 = vpop.f32.mrf.mxu0 }
 0x3e1   : > { %v559_v6 = vadd.f32 %v876_v4, %v556_v5 }
 0x3e3   : > { %v878_v7 = vmul.f32 -1.442695, %v559_v6 }
 0x3e5   : > { %937 = vpow2.f32 %v878_v7 }
 0x3eb   : > { %v938_v8 = vpop.eup %937 }
 0x3ec   : > { %v563_v9 = vadd.f32 1.0, %v938_v8 }
 0x3ee   : > { %939 = vrcp.f32 %v563_v9  ;;  %v575_v13 = vand.u32 2147483648, %v563_v9  ;;  %v573_v15 = vand.u32 2147483647, %v563_v9  ;;  %vm569_vm13 = vweird.f32 %v563_v9 }
 0x3f0   : > { %v576_v17 = vor.u32 1.1754944e-38, %v575_v13  ;;  %vm574_vm15 = vcmp.eq.f32.partialorder %v573_v15, 8.507059e+37 }
 0x3f4   : > { %v940_v10 = vpop.eup %939 }
 0x3f5   : > { %v565_v11 = vmul.f32 %v940_v10, %v563_v9  ;;  %vm570_vm12 = vweird.f32 %v940_v10 }
 0x3f6   : > { %vm571_vm14 = vmor %vm569_vm13, %vm570_vm12 }
 0x3f7   : > { %v566_v12 = vsub.f32 1.0, %v565_v11 }
 0x3f9   : > { %v567_v14 = vmul.f32 %v940_v10, %v566_v12 }
 0x3fb   : > { %v568_v16 = vadd.f32 %v940_v10, %v567_v14 }
 0x3fd   : > { %v572_v18 = vsel %vm571_vm14, %v940_v10, %v568_v16 }
 0x3fe   : > { %v577_v20 = vsel %vm574_vm15, %v576_v17, %v572_v18 }
 0x3ff   : > { %v584_v21 = vmul.f32 %v582_v19, %v577_v20  ;;  %v612_v26 = vsub.f32 1.0, %v577_v20 }
 0x401   : > { %586 = vrot.lane.b32.xlu2 %v584_v21, %s1006_s17  ;;  %v613_v29 = vmul.f32 %v612_v26, %v531_v3 }
 0x45b   : > { %v587_v22 = vpop.permute.xlu2 %586 }
 0x45c   : > { %880 = vmatmul.msk.f32.vlgmr.msrb.gmra.mxu1 %vm357_vm1, %v587_v22 }
 0x4d9   : > { %v607_v24 = vpop.f32.mrf.mxu1 }
 0x4da   : > { %v610_v25 = vadd.f32 %v879_v23, %v607_v24 }
 0x4dc   : > { %941 = vtanh.f32 %v610_v25 }
 0x4e2   : > { %v942_v28 = vpop.eup %941 }
 0x4e3   : > { %v614_v30 = vmul.f32 %v942_v28, %v577_v20 }
 0x4e5   : > { %v615_v31 = vadd.f32 %v614_v30, %v613_v29 }
 0x4e7   : > { %v621_v32 = vsel %vm620_vm0, %v615_v31, %v531_v3 }
 0x4e8   : > { %671 = vrot.lane.b32.xlu0 %v621_v32, %s1005_s27  ;;  %881 = vst.msk [vmem:[%s1079_s13 + $0x10] sm:$0xff] %vm357_vm1, %v621_v32  ;;  %883 = vmatmul.msk.f32.vlgmr.msrb.gmra.mxu2 %vm357_vm1, %v621_v32  ;;  %s708_s27 = scalar_select %p707_p9, 1, 0 }
 0x4ea   : > { %v709_v56 = vstv %s708_s27 }
 0x4eb   : > { %vm710_vm6 = vcmp.eq.s32.totalorder %v709_v56, 1 }
 0x55a   : > { %v672_v48 = vpop.permute.xlu0 %671 }
 0x56b   : > { %v646_v34 = vpop.f32.mrf.mxu2 }
 0x56c   : > { %v649_v35 = vadd.f32 %v882_v33, %v646_v34 }
 0x56e   : > { %v884_v36 = vmul.f32 -1.442695, %v649_v35 }
 0x570   : > { %943 = vpow2.f32 %v884_v36 }
 0x576   : > { %v944_v37 = vpop.eup %943 }
 0x577   : > { %v653_v38 = vadd.f32 1.0, %v944_v37 }
 0x579   : > { %945 = vrcp.f32 %v653_v38  ;;  %v665_v42 = vand.u32 2147483648, %v653_v38  ;;  %v663_v44 = vand.u32 2147483647, %v653_v38  ;;  %vm659_vm3 = vweird.f32 %v653_v38 }
 0x57b   : > { %v666_v46 = vor.u32 1.1754944e-38, %v665_v42  ;;  %vm664_vm5 = vcmp.eq.f32.partialorder %v663_v44, 8.507059e+37 }
 0x57f   : > { %v946_v39 = vpop.eup %945 }
 0x580   : > { %v655_v40 = vmul.f32 %v946_v39, %v653_v38  ;;  %vm660_vm2 = vweird.f32 %v946_v39 }
 0x581   : > { %vm661_vm4 = vmor %vm659_vm3, %vm660_vm2 }
 0x582   : > { %v656_v41 = vsub.f32 1.0, %v655_v40 }
 0x584   : > { %v657_v43 = vmul.f32 %v946_v39, %v656_v41 }
 0x586   : > { %v658_v45 = vadd.f32 %v946_v39, %v657_v43 }
 0x588   : > { %v662_v47 = vsel %vm661_vm4, %v946_v39, %v658_v45 }
 0x589   : > { %v667_v49 = vsel %vm664_vm5, %v666_v46, %v662_v47 }
 0x58a   : > { %v674_v50 = vmul.f32 %v672_v48, %v667_v49  ;;  %v702_v55 = vsub.f32 1.0, %v667_v49 }
 0x58c   : > { %676 = vrot.lane.b32.xlu1 %v674_v50, %s1006_s17  ;;  %v703_v58 = vmul.f32 %v702_v55, %v621_v32 }
 0x5fe   : > { %v677_v51 = vpop.permute.xlu1 %676 }
 0x5ff   : > { %886 = vmatmul.msk.f32.vlgmr.msrb.gmra.mxu3 %vm357_vm1, %v677_v51 }
 0x682   : > { %v697_v53 = vpop.f32.mrf.mxu3 }
 0x683   : > { %v700_v54 = vadd.f32 %v885_v52, %v697_v53 }
 0x685   : > { %947 = vtanh.f32 %v700_v54 }
 0x68b   : > { %v948_v57 = vpop.eup %947 }
 0x68c   : > { %v704_v59 = vmul.f32 %v948_v57, %v667_v49 }
 0x68e   : > { %v705_v60 = vadd.f32 %v704_v59, %v703_v58 }
 0x690   : > { %v711_v61 = vsel %vm710_vm6, %v705_v60, %v621_v32 }
 0x691   : > { %887 = vst.msk [vmem:[%s1079_s13 + $0x18] sm:$0xff] %vm357_vm1, %v711_v61 }
 0x692   : > { %714 = vst.msk [vmem:[#allocation2] sm:$0xff] %vm357_vm1, %v711_v61 }
 0x693   : > { %893 = dma.vmem_to_hbm [thread:$0]  (%p896_p10), %s736_s30, 128, %s738_s26, [#allocation3]  }
 0x694   : > { %990 = dma.done.wait (%p896_p10), [#allocation3], 128  }
 0x695   : > { %992 = vsyncadd (%p896_p10), [#allocation3], 4294967168 }
 0x696 PF: > { %s18_s23 = sadd.s32 1, %s1003_s23   ;;  %s1172_s21 = smov %s999_s22 }
 0x697   : > { %p15_p11 = scmp.ge.s32.totalorder %s18_s23, 5   ;;  %s1173_s22 = smov %s1175_s25 }
 0x699   :  { %17 = sbr.rel (!%p15_p11) target bundleno = 2 (0x2), region = 99 }
 0x69e   :  { %762 = vsyncpa [#allocation3], 1 }
 0x69f   :  { %764 = vsyncpa [#allocation3 + $0x1], 1 }

</bundles_post_ra>
